<compile_context>
chip_gen: v6e
topology: v6e:2x2x1
jax: 0.10.0
libtpu: 0.0.40
codegen_flags: <defaults>
</compile_context>

<pallas_src>
import functools

import numpy as np
import jax
import jax.numpy as jnp
from jax import lax
from jax.experimental import pallas as pl
from jax.experimental.pallas import tpu as pltpu

BN_EPS = 1e-5
GROUPS = 32          # ResNeXt 32x8d
BASE_WIDTH = 8
EXPANSION = 4

VMEM_LIMIT = 32 * 1024 * 1024   # <= default scoped on v6e/v7x, raises v5e's 16 MiB default


# --------------------------------------------------------------------------------------
# Helpers
# --------------------------------------------------------------------------------------

def _round_up(x, m):
    return -(-x // m) * m


def _pick_tile(dim, candidates):
    """Largest candidate tile that divides `dim`; else the full dim (caller keeps it small)."""
    for c in candidates:
        if c <= dim and dim % c == 0:
            return c
    return dim


# --------------------------------------------------------------------------------------
# Pallas kernels
# --------------------------------------------------------------------------------------

def _gemm_kernel(a_ref, w_ref, b_ref, o_ref, acc_ref, *, relu):
    """Tiled GEMM: out = act(A @ W + bias).  K axis is the (innermost) reduction axis."""
    @pl.when(pl.program_id(2) == 0)
    def _():
        acc_ref[...] = jnp.zeros_like(acc_ref)

    acc_ref[...] += jnp.dot(a_ref[...], w_ref[...],
                            preferred_element_type=jnp.float32)

    @pl.when(pl.program_id(2) == pl.num_programs(2) - 1)
    def _():
        y = acc_ref[...] + b_ref[...]
        if relu:
            y = jnp.maximum(y, 0.0)
        o_ref[...] = y.astype(o_ref.dtype)


def _gemm_res_kernel(a_ref, w_ref, b_ref, r_ref, o_ref, acc_ref, *, relu):
    """Same as _gemm_kernel but with a fused residual add in the epilogue."""
    @pl.when(pl.program_id(2) == 0)
    def _():
        acc_ref[...] = jnp.zeros_like(acc_ref)

    acc_ref[...] += jnp.dot(a_ref[...], w_ref[...],
                            preferred_element_type=jnp.float32)

    @pl.when(pl.program_id(2) == pl.num_programs(2) - 1)
    def _():
        y = acc_ref[...] + b_ref[...] + r_ref[...].astype(jnp.float32)
        if relu:
            y = jnp.maximum(y, 0.0)
        o_ref[...] = y.astype(o_ref.dtype)


def _grouped_gemm_kernel(a_ref, w_ref, b_ref, o_ref):
    """One wide MXU dot per step using the block-diagonal grouped weight.

    a_ref: (tm, Gb*Kg) bf16   w_ref: (1, Gb*Kg, Gb*CoutG) bf16   b_ref: (1, Gb*CoutG) f32
    o_ref: (tm, Gb*CoutG) bf16 — single lane-dense (256-lane) store, final channel layout.
    """
    acc = jnp.dot(a_ref[...], w_ref[0], preferred_element_type=jnp.float32)
    o_ref[...] = jnp.maximum(acc + b_ref[...], 0.0).astype(o_ref.dtype)


def _maxpool_rows_kernel(r0_ref, r1_ref, r2_ref, o_ref):
    """Vertical 3-tap max over three row strips (stride-2 row selection via index maps)."""
    o_ref[...] = jnp.maximum(jnp.maximum(r0_ref[...], r1_ref[...]), r2_ref[...])


# --------------------------------------------------------------------------------------
# Pallas call wrappers
# --------------------------------------------------------------------------------------

def _dense_gemm(a, w, b, r, relu):
    """a: (M, K) bf16; w: (K, N) bf16; b: (1, N) f32; r: optional (M, N) bf16."""
    M, K = a.shape
    N = w.shape[1]

    # Pad M so tiles never silently become the full dimension (VMEM safety on v7x).
    M_pad = _round_up(M, 256) if M >= 256 else _round_up(M, 8)
    if M_pad != M:
        a = jnp.pad(a, ((0, M_pad - M), (0, 0)))
        if r is not None:
            r = jnp.pad(r, ((0, M_pad - M), (0, 0)))

    tm = _pick_tile(M_pad, (512, 256, 128))
    tn = _pick_tile(N, (512, 256, 128))
    tk = _pick_tile(K, (1024, 512, 256, 128))   # K in this net is small when not 128-divisible
    grid = (M_pad // tm, N // tn, K // tk)

    in_specs = [
        pl.BlockSpec((tm, tk), lambda m, n, k: (m, k)),
        pl.BlockSpec((tk, tn), lambda m, n, k: (k, n)),
        pl.BlockSpec((1, tn), lambda m, n, k: (0, n)),
    ]
    args = [a, w, b]
    if r is not None:
        in_specs.append(pl.BlockSpec((tm, tn), lambda m, n, k: (m, n)))
        args.append(r)
        kern = functools.partial(_gemm_res_kernel, relu=relu)
    else:
        kern = functools.partial(_gemm_kernel, relu=relu)

    out = pl.pallas_call(
        kern,
        grid=grid,
        in_specs=in_specs,
        out_specs=pl.BlockSpec((tm, tn), lambda m, n, k: (m, n)),
        out_shape=jax.ShapeDtypeStruct((M_pad, N), jnp.bfloat16),
        scratch_shapes=[pltpu.VMEM((tm, tn), jnp.float32)],
        compiler_params=pltpu.CompilerParams(
            dimension_semantics=("parallel", "parallel", "arbitrary"),
            vmem_limit_bytes=VMEM_LIMIT),
    )(*args)
    return out[:M] if M_pad != M else out


@functools.partial(jax.jit,
                   static_argnames=("kh", "kw", "stride", "padding", "relu", "cout"))
def conv_bn_act(x, wm, bias, residual=None, *, kh, kw, stride, padding, relu, cout):
    """Dense (groups=1) Conv2d + folded eval-mode BN + optional residual + optional ReLU.

    x: (B, H, W, Cin) NHWC bf16;  wm: (KH*KW*Cin, N_pad) bf16 prepared weight;
    bias: (1, N_pad) f32.  residual (if given): (B, Ho, Wo, cout) bf16 fused in the epilogue.
    """
    B, H, W_, Cin = x.shape
    Ho = (H + 2 * padding - kh) // stride + 1
    Wo = (W_ + 2 * padding - kw) // stride + 1
    M = B * Ho * Wo
    K = kh * kw * Cin

    if kh == 1 and kw == 1 and padding == 0:
        a = x[:, ::stride, ::stride, :].reshape(M, Cin)    # 1x1 conv: pure reshape/slice
    else:
        xp = jnp.pad(x, ((0, 0), (padding, padding), (padding, padding), (0, 0)))
        cols = [xp[:, dy:dy + (Ho - 1) * stride + 1:stride,
                   dx:dx + (Wo - 1) * stride + 1:stride, :]
                for dy in range(kh) for dx in range(kw)]
        a = jnp.stack(cols, axis=3).reshape(M, K)
    a = a.astype(jnp.bfloat16)

    r = None
    if residual is not None:
        r = residual.reshape(M, residual.shape[-1]).astype(jnp.bfloat16)
        if r.shape[1] != wm.shape[1]:
            r = jnp.pad(r, ((0, 0), (0, wm.shape[1] - r.shape[1])))

    out = _dense_gemm(a, wm, bias, r, relu)                # (M, N_pad) bf16, final layout
    if out.shape[1] != cout:
        out = out[:, :cout]                                # drop stem's zero-padded channels
    return out.reshape(B, Ho, Wo, cout)


@functools.partial(jax.jit,
                   static_argnames=("stride", "gb", "coutg", "cg", "cout", "groups"))
def grouped_conv3x3_bn_relu(x, wbd, bias, *, stride, gb, coutg, cg, cout, groups):
    """Grouped 3x3 Conv2d (groups=32) + folded BN + ReLU via block-diagonal packed GEMM.

    x: (B, H, W, C) bf16;  wbd: (G//Gb, Gb*Kg, Gb*CoutG) bf16 block-diagonal weight;
    bias: (1, Cout) f32.  Output lands directly in (M, Cout) channel order.
    """
    B, H, W_, C = x.shape
    G = groups
    kg = cg * 9
    Ho = (H + 2 - 3) // stride + 1
    Wo = (W_ + 2 - 3) // stride + 1
    M = B * Ho * Wo

    # Group-major K layout: A[:, g*Kg + tap*Cg + c]  (matches the block-diagonal weight).
    xp = jnp.pad(x, ((0, 0), (1, 1), (1, 1), (0, 0))).reshape(B, H + 2, W_ + 2, G, cg)
    cols = [xp[:, dy:dy + (Ho - 1) * stride + 1:stride,
               dx:dx + (Wo - 1) * stride + 1:stride, :, :]
            for dy in range(3) for dx in range(3)]
    a = jnp.stack(cols, axis=4).reshape(M, G * kg).astype(jnp.bfloat16)

    M_pad = _round_up(M, 256) if M >= 256 else _round_up(M, 8)
    if M_pad != M:
        a = jnp.pad(a, ((0, M_pad - M), (0, 0)))
    tm = _pick_tile(M_pad, (512, 256, 128))

    nblk = G // gb
    nlanes = gb * coutg          # 256 for ResNeXt 32x8d
    kwidth = gb * kg             # 2304 for ResNeXt 32x8d (lane-dense K)

    out = pl.pallas_call(
        _grouped_gemm_kernel,
        grid=(M_pad // tm, nblk),
        in_specs=[
            pl.BlockSpec((tm, kwidth), lambda m, g: (m, g)),
            pl.BlockSpec((1, kwidth, nlanes), lambda m, g: (g, 0, 0)),
            pl.BlockSpec((1, nlanes), lambda m, g: (0, g)),
        ],
        out_specs=pl.BlockSpec((tm, nlanes), lambda m, g: (m, g)),
        out_shape=jax.ShapeDtypeStruct((M_pad, cout), jnp.bfloat16),
        compiler_params=pltpu.CompilerParams(
            dimension_semantics=("parallel", "parallel"),
            vmem_limit_bytes=VMEM_LIMIT),
    )(a, wbd, bias)
    return out[:M].reshape(B, Ho, Wo, cout)


@jax.jit
def maxpool_3x3_s2_p1(x):
    """MaxPool2d(kernel=3, stride=2, padding=1) on NHWC input.

    Separable: horizontal 3-tap stride-2 max via cheap XLA strided views, then a Pallas
    kernel takes the vertical 3-tap max from three overlapping row-strip BlockSpecs.
    """
    B, H, W_, C = x.shape
    Ho = (H + 2 - 3) // 2 + 1
    Wo = (W_ + 2 - 3) // 2 + 1
    xp = jnp.pad(x, ((0, 0), (1, 1), (1, 1), (0, 0)), constant_values=-jnp.inf)
    hmax = jnp.maximum(
        jnp.maximum(xp[:, :, 0:2 * Wo - 1:2, :], xp[:, :, 1:2 * Wo:2, :]),
        xp[:, :, 2:2 * Wo + 1:2, :])                              # (B, H+2, Wo, C)

    return pl.pallas_call(
        _maxpool_rows_kernel,
        grid=(Ho,),
        in_specs=[pl.BlockSpec((B, 1, Wo, C), lambda r: (0, 2 * r, 0, 0)),
                  pl.BlockSpec((B, 1, Wo, C), lambda r: (0, 2 * r + 1, 0, 0)),
                  pl.BlockSpec((B, 1, Wo, C), lambda r: (0, 2 * r + 2, 0, 0))],
        out_specs=pl.BlockSpec((B, 1, Wo, C), lambda r: (0, r, 0, 0)),
        out_shape=jax.ShapeDtypeStruct((B, Ho, Wo, C), x.dtype),
        compiler_params=pltpu.CompilerParams(dimension_semantics=("arbitrary",)),
    )(hmax, hmax, hmax)


# --------------------------------------------------------------------------------------
# Weight preparation (hoisted out of the forward path; runs once)
# --------------------------------------------------------------------------------------

def _fold_bn(w, bn):
    gamma, beta, mean, var = bn
    scale = gamma / jnp.sqrt(var + BN_EPS)
    return w * scale[:, None, None, None], beta - mean * scale


def _prep_dense(w, bn, *, stride, padding):
    cout, cin, kh, kw = w.shape
    w_f, bias = _fold_bn(w, bn)
    K = kh * kw * cin
    n_pad = _round_up(cout, 128)                           # stem 64 -> 128 (lane-dense)
    wm = jnp.transpose(w_f, (2, 3, 1, 0)).reshape(K, cout)
    if n_pad != cout:
        wm = jnp.pad(wm, ((0, 0), (0, n_pad - cout)))
        bias = jnp.pad(bias, ((0, n_pad - cout),))
    return {"wm": wm.astype(jnp.bfloat16),
            "bias": bias.reshape(1, n_pad).astype(jnp.float32),
            "kh": int(kh), "kw": int(kw), "stride": int(stride),
            "padding": int(padding), "cout": int(cout)}


def _prep_grouped(w, bn, *, stride, groups=GROUPS):
    cout, cg, kh, kw = w.shape                             # kh = kw = 3
    G = groups
    coutg = cout // G
    kg = cg * kh * kw
    w_f, bias = _fold_bn(w, bn)
    # Per-group (Kg, CoutG) with K-order (dy, dx, c) to match the activation slab.
    wg = jnp.transpose(w_f.reshape(G, coutg, cg, kh, kw), (0, 3, 4, 2, 1)).reshape(G, kg, coutg)
    gb = max(1, min(G, 256 // coutg))
    while G % gb:
        gb -= 1
    eye = jnp.eye(gb, dtype=wg.dtype)
    wbd = jnp.einsum("bipq,ij->bipjq", wg.reshape(G // gb, gb, kg, coutg), eye)
    wbd = wbd.reshape(G // gb, gb * kg, gb * coutg).astype(jnp.bfloat16)
    return {"w": wbd, "bias": bias.reshape(1, cout).astype(jnp.float32),
            "stride": int(stride), "gb": int(gb), "coutg": int(coutg),
            "cg": int(cg), "cout": int(cout), "groups": int(G)}


def prepare_encoder_weights(params):
    prep = {"conv1": _prep_dense(params["conv1"], params["bn1"], stride=2, padding=3),
            "layers": []}
    for li in range(1, 5):
        blocks = []
        for p in params[f"layer{li}"]:
            bp = {"conv1": _prep_dense(p["conv1"], p["bn1"], stride=1, padding=0),
                  "conv2": _prep_grouped(p["conv2"], p["bn2"], stride=p["stride"]),
                  "conv3": _prep_dense(p["conv3"], p["bn3"], stride=1, padding=0)}
            if "down_conv" in p:
                bp["down"] = _prep_dense(p["down_conv"], p["down_bn"],
                                         stride=p["stride"], padding=0)
            blocks.append(bp)
        prep["layers"].append(blocks)
    return prep


# --------------------------------------------------------------------------------------
# Deterministic parameter construction (ResNeXt-101 32x8d shapes)
# --------------------------------------------------------------------------------------

def _conv_init(key, cout, cin_g, kh, kw):
    fan_in = cin_g * kh * kw
    std = (2.0 / fan_in) ** 0.5
    return std * jax.random.normal(key, (cout, cin_g, kh, kw), jnp.float32)


def _bn_init(key, c):
    k1, k2 = jax.random.split(key)
    gamma = 1.0 + 0.05 * jax.random.normal(k1, (c,), jnp.float32)
    beta = 0.05 * jax.random.normal(k2, (c,), jnp.float32)
    mean = jnp.zeros((c,), jnp.float32)   # eval-mode running stats
    var = jnp.ones((c,), jnp.float32)
    return (gamma, beta, mean, var)


def _make_bottleneck(key, inplanes, planes, stride, downsample):
    width = int(planes * (BASE_WIDTH / 64.0)) * GROUPS
    ks = jax.random.split(key, 8)
    p = {
        "conv1": _conv_init(ks[0], width, inplanes, 1, 1), "bn1": _bn_init(ks[1], width),
        "conv2": _conv_init(ks[2], width, width // GROUPS, 3, 3), "bn2": _bn_init(ks[3], width),
        "conv3": _conv_init(ks[4], planes * EXPANSION, width, 1, 1),
        "bn3": _bn_init(ks[5], planes * EXPANSION),
        "stride": stride,
    }
    if downsample:
        p["down_conv"] = _conv_init(ks[6], planes * EXPANSION, inplanes, 1, 1)
        p["down_bn"] = _bn_init(ks[7], planes * EXPANSION)
    return p


def make_encoder_params(key, num_input_channels=3):
    params = {}
    key, k1, k2 = jax.random.split(key, 3)
    params["conv1"] = _conv_init(k1, 64, num_input_channels, 7, 7)
    params["bn1"] = _bn_init(k2, 64)
    inplanes = 64
    cfg = [(64, 3, 1), (128, 4, 2), (256, 23, 2), (512, 3, 2)]   # ResNeXt-101 layers
    for li, (planes, nblocks, stride) in enumerate(cfg, start=1):
        blocks = []
        for b in range(nblocks):
            key, sub = jax.random.split(key)
            s = stride if b == 0 else 1
            ds = (b == 0) and (s != 1 or inplanes != planes * EXPANSION)
            blocks.append(_make_bottleneck(sub, inplanes, planes, s, ds))
            inplanes = planes * EXPANSION
        params[f"layer{li}"] = blocks
    return params


# --------------------------------------------------------------------------------------
# Encoder forward (Pallas path, prepared weights)
# --------------------------------------------------------------------------------------

def _run_dense(x, cp, residual=None, relu=True):
    return conv_bn_act(x, cp["wm"], cp["bias"], residual,
                       kh=cp["kh"], kw=cp["kw"], stride=cp["stride"],
                       padding=cp["padding"], relu=relu, cout=cp["cout"])


def _run_grouped(x, gp):
    return grouped_conv3x3_bn_relu(x, gp["w"], gp["bias"], stride=gp["stride"],
                                   gb=gp["gb"], coutg=gp["coutg"], cg=gp["cg"],
                                   cout=gp["cout"], groups=gp["groups"])


def _bottleneck_forward(x, bp):
    out = _run_dense(x, bp["conv1"], relu=True)
    out = _run_grouped(out, bp["conv2"])
    if "down" in bp:
        identity = _run_dense(x, bp["down"], relu=False)
    else:
        identity = x
    # conv3 + BN3 + residual add + ReLU fused into one GEMM epilogue.
    return _run_dense(out, bp["conv3"], residual=identity, relu=True)


def resnet_encoder_forward(x_nchw, prep):
    """Equivalent of ResnetEncoder.forward: returns [x0, x1, x2, x3, x4], each NCHW f32."""
    x = jnp.transpose(x_nchw, (0, 2, 3, 1)).astype(jnp.bfloat16)          # NCHW -> NHWC bf16
    x0 = _run_dense(x, prep["conv1"], relu=True)
    feats = [x0]
    cur = maxpool_3x3_s2_p1(x0)                                           # 1/4 res
    for blocks in prep["layers"]:
        for bp in blocks:
            cur = _bottleneck_forward(cur, bp)
        feats.append(cur)
    return [jnp.transpose(f, (0, 3, 1, 2)).astype(jnp.float32) for f in feats]


# --------------------------------------------------------------------------------------
# Pure-JAX reference (mirrors the bf16-operand / f32-accumulate dtype flow)
# --------------------------------------------------------------------------------------

def _conv_bn_ref(x, w, gamma, beta, mean, var, *, stride, padding, groups):
    scale = gamma / jnp.sqrt(var + BN_EPS)
    bias = beta - mean * scale
    wj = jnp.transpose((w * scale[:, None, None, None]).astype(jnp.bfloat16), (2, 3, 1, 0))
    out = lax.conv_general_dilated(
        x, wj, window_strides=(stride, stride),
        padding=((padding, padding), (padding, padding)),
        dimension_numbers=("NHWC", "HWIO", "NHWC"),
        feature_group_count=groups, preferred_element_type=jnp.float32)
    return out + bias          # f32 pre-activation


def _maxpool_ref(x):
    init = jnp.asarray(-jnp.inf, x.dtype)
    return lax.reduce_window(x, init, lax.max, (1, 3, 3, 1), (1, 2, 2, 1),
                             [(0, 0), (1, 1), (1, 1), (0, 0)])


def _bottleneck_ref(x, p):
    out = jnp.maximum(_conv_bn_ref(x, p["conv1"], *p["bn1"], stride=1, padding=0, groups=1),
                      0.0).astype(jnp.bfloat16)
    out = jnp.maximum(_conv_bn_ref(out, p["conv2"], *p["bn2"], stride=p["stride"], padding=1,
                                   groups=GROUPS), 0.0).astype(jnp.bfloat16)
    out3 = _conv_bn_ref(out, p["conv3"], *p["bn3"], stride=1, padding=0, groups=1)
    if "down_conv" in p:
        identity = _conv_bn_ref(x, p["down_conv"], *p["down_bn"], stride=p["stride"],
                                padding=0, groups=1).astype(jnp.bfloat16)
    else:
        identity = x
    return jnp.maximum(out3 + identity.astype(jnp.float32), 0.0).astype(jnp.bfloat16)


def resnet_encoder_forward_ref(x_nchw, params):
    x = jnp.transpose(x_nchw, (0, 2, 3, 1)).astype(jnp.bfloat16)
    x0 = jnp.maximum(_conv_bn_ref(x, params["conv1"], *params["bn1"], stride=2, padding=3,
                                  groups=1), 0.0).astype(jnp.bfloat16)
    feats = [x0]
    cur = _maxpool_ref(x0)
    for li in range(1, 5):
        for p in params[f"layer{li}"]:
            cur = _bottleneck_ref(cur, p)
        feats.append(cur)
    return [jnp.transpose(f, (0, 3, 1, 2)).astype(jnp.float32) for f in feats]


# --------------------------------------------------------------------------------------

if __name__ == "__main__":
    key = jax.random.PRNGKey(0)
    pkey, xkey = jax.random.split(key)

    params = make_encoder_params(pkey, num_input_channels=3)
    prep = prepare_encoder_weights(params)                       # weight prep runs once
    x = jax.random.normal(xkey, (2, 3, 64, 64), jnp.float32)     # NCHW, like PyTorch input

    feats = jax.block_until_ready(resnet_encoder_forward(x, prep))

    # num_ch_enc = [64, 256, 512, 1024, 2048], strides 1/2 .. 1/32
    expected = [(2, 64, 32, 32), (2, 256, 16, 16), (2, 512, 8, 8),
                (2, 1024, 4, 4), (2, 2048, 2, 2)]
    for f, shp in zip(feats, expected):
        assert f.shape == shp, (f.shape, shp)
        assert f.dtype == jnp.float32
        assert bool(jnp.all(jnp.isfinite(f)))

    ref = jax.block_until_ready(resnet_encoder_forward_ref(x, params))
    for i, (f, r) in enumerate(zip(feats, ref)):
        fn, rn = np.asarray(f), np.asarray(r)
        err = float(np.max(np.abs(fn - rn)) / (np.max(np.abs(rn)) + 1e-6))
        assert err < 3e-2, (i, err)

    print("KERNEL_OK")
</pallas_src>

<mosaic_0001>
module attributes {stable_mosaic.version = 11 : i64} {
  func.func @_gemm_kernel(%arg0: i32, %arg1: i32, %arg2: i32, %arg3: memref<512x147xbf16, #tpu.memory_space<vmem>>, %arg4: memref<147x128xbf16, #tpu.memory_space<vmem>>, %arg5: memref<1x128xf32, #tpu.memory_space<vmem>>, %arg6: memref<512x128xbf16, #tpu.memory_space<vmem>>, %arg7: memref<512x128xf32, #tpu.memory_space<vmem>>) attributes {dimension_semantics = [#tpu.dimension_semantics<parallel>, #tpu.dimension_semantics<parallel>, #tpu.dimension_semantics<arbitrary>], iteration_bounds = array<i64: 4, 1, 1>, scalar_prefetch = 0 : i64, scratch_operands = 1 : i64, tpu.core_type = #tpu.core_type<tc>, window_params = [{transform_indices = @transform_0, window_bounds = array<i64: 512, 147>}, {transform_indices = @transform_1, window_bounds = array<i64: 147, 128>}, {transform_indices = @transform_2, window_bounds = array<i64: 1, 128>}, {transform_indices = @transform_3, window_bounds = array<i64: 512, 128>}]} {
    %c0_i32 = arith.constant 0 : i32
    %0 = arith.cmpi eq, %arg2, %c0_i32 : i32
    %1 = arith.extui %0 : i1 to i32
    %c0_i32_0 = arith.constant 0 : i32
    %2 = arith.cmpi ne, %1, %c0_i32_0 : i32
    scf.if %2 {
      %cst_10 = arith.constant 0.000000e+00 : f32
      %12 = vector.broadcast %cst_10 : f32 to vector<512x128xf32>
      %c0_11 = arith.constant 0 : index
      %c0_12 = arith.constant 0 : index
      %13 = vector.load %arg7[%c0_11, %c0_12] : memref<512x128xf32, #tpu.memory_space<vmem>>, vector<512x128xf32>
      tpu.vector_store %arg7[%c0_11, %c0_12], %12 {strides = array<i32>} : memref<512x128xf32, #tpu.memory_space<vmem>>, vector<512x128xf32>,
    } else {
    }
    %c0 = arith.constant 0 : index
    %c0_1 = arith.constant 0 : index
    %3 = vector.load %arg7[%c0, %c0_1] : memref<512x128xf32, #tpu.memory_space<vmem>>, vector<512x128xf32>
    %c0_2 = arith.constant 0 : index
    %c0_3 = arith.constant 0 : index
    %4 = vector.load %arg3[%c0_2, %c0_3] : memref<512x147xbf16, #tpu.memory_space<vmem>>, vector<512x147xbf16>
    %c0_4 = arith.constant 0 : index
    %c0_5 = arith.constant 0 : index
    %5 = vector.load %arg4[%c0_4, %c0_5] : memref<147x128xbf16, #tpu.memory_space<vmem>>, vector<147x128xbf16>
    %cst = arith.constant dense<0.000000e+00> : vector<512x128xf32>
    %6 = tpu.matmul %4, %5, %cst {dimension_numbers = #tpu.dot_dimension_numbers<[1], [0], [0], [1], [0, 0, 1, 1], [], []>} : vector<512x147xbf16>, vector<147x128xbf16>, vector<512x128xf32> -> vector<512x128xf32>
    %7 = arith.addf %3, %6 : vector<512x128xf32>
    %c0_6 = arith.constant 0 : index
    %c0_7 = arith.constant 0 : index
    %8 = vector.load %arg7[%c0_6, %c0_7] : memref<512x128xf32, #tpu.memory_space<vmem>>, vector<512x128xf32>
    tpu.vector_store %arg7[%c0_6, %c0_7], %7 {strides = array<i32>} : memref<512x128xf32, #tpu.memory_space<vmem>>, vector<512x128xf32>,
    %c0_i32_8 = arith.constant 0 : i32
    %9 = arith.cmpi eq, %arg2, %c0_i32_8 : i32
    %10 = arith.extui %9 : i1 to i32
    %c0_i32_9 = arith.constant 0 : i32
    %11 = arith.cmpi ne, %10, %c0_i32_9 : i32
    scf.if %11 {
      %c0_10 = arith.constant 0 : index
      %c0_11 = arith.constant 0 : index
      %12 = vector.load %arg7[%c0_10, %c0_11] : memref<512x128xf32, #tpu.memory_space<vmem>>, vector<512x128xf32>
      %c0_12 = arith.constant 0 : index
      %c0_13 = arith.constant 0 : index
      %13 = vector.load %arg5[%c0_12, %c0_13] : memref<1x128xf32, #tpu.memory_space<vmem>>, vector<1x128xf32>
      %14 = vector.broadcast %13 : vector<1x128xf32> to vector<512x128xf32>
      %15 = arith.addf %12, %14 : vector<512x128xf32>
      %cst_14 = arith.constant 0.000000e+00 : f32
      %16 = vector.broadcast %cst_14 : f32 to vector<512x128xf32>
      %17 = arith.maximumf %15, %16 : vector<512x128xf32>
      %18 = arith.truncf %17 : vector<512x128xf32> to vector<512x128xbf16>
      %c0_15 = arith.constant 0 : index
      %c0_16 = arith.constant 0 : index
      %19 = vector.load %arg6[%c0_15, %c0_16] : memref<512x128xbf16, #tpu.memory_space<vmem>>, vector<512x128xbf16>
      tpu.vector_store %arg6[%c0_15, %c0_16], %18 {strides = array<i32>} : memref<512x128xbf16, #tpu.memory_space<vmem>>, vector<512x128xbf16>,
    } else {
    }
    return
  }
  func.func @transform_0(%arg0: i32, %arg1: i32, %arg2: i32) -> (i32, i32) {
    %c0_i32 = arith.constant 0 : i32
    return %arg0, %arg2 : i32, i32
  }
  func.func @transform_1(%arg0: i32, %arg1: i32, %arg2: i32) -> (i32, i32) {
    %c0_i32 = arith.constant 0 : i32
    return %arg2, %arg1 : i32, i32
  }
  func.func @transform_2(%arg0: i32, %arg1: i32, %arg2: i32) -> (i32, i32) {
    %c0_i32 = arith.constant 0 : i32
    %c0_i32_0 = arith.constant 0 : i32
    return %c0_i32, %arg1 : i32, i32
  }
  func.func @transform_3(%arg0: i32, %arg1: i32, %arg2: i32) -> (i32, i32) {
    %c0_i32 = arith.constant 0 : i32
    return %arg0, %arg1 : i32, i32
  }
}

</mosaic_0001>

<bundles_post_ra>
// kernel: conv_bn_act.1
= control target key start
LH: loop header
LB: loop body
LE: loop exit
PB: predicated region body
PF: predicated region fallthrough
CT: control target
= control target key end

     0   :  { %8 = vsyncpa [#allocation4], 0  ;;  %s3070_s0 = inlined_call_operand.vmem [shape: bf16[2048,147], index: 0, kind: input, shape index: {}]   ;;  %s3071_s1 = inlined_call_operand.vmem [shape: bf16[147,128], index: 1, kind: input, shape index: {}]   ;;  %s3072_s2 = inlined_call_operand.vmem [shape: f32[1,128], index: 2, kind: input, shape index: {}]   ;;  %s3073_s3 = inlined_call_operand.hbm [shape: bf16[2048,128], index: 3, kind: output, shape index: {}]  }
   0x1   :  { %10 = vsyncpa [#allocation4 + $0x1], 0  ;;  %s2721_s12 = smov 0   ;;  %s2723_s13 = smov 0  }
   0x2   :  { %s2725_s14 = smov 0   ;;  %s2727_s15 = smov 0  }
   0x3   :  { %s2729_s16 = smov 0   ;;  %s2731_s17 = smov 0  }
   0x4 LB: > { %s1989_s18 = sadd.s32 4294967295, %s2694_s17   ;;  %s1990_s19 = sadd.s32 4294967294, %s2694_s17   ;;  %s2694_s17 = sphi %s2731_s17, %s16_s17   ;;  %s2690_s16 = sphi %s2729_s16, %s3080_s16   ;;  %s2686_s15 = sphi %s2727_s15, %s3079_s15   ;;  %s2682_s14 = sphi %s2725_s14, %s3078_s14   ;;  %s2678_s13 = sphi %s2723_s13, %s3077_s13   ;;  %s2674_s12 = sphi %s2721_s12, %s3076_s12  }
   0x5   : > { %s35_s20 = sadd.s32 1, %s2690_s16  ;;  %s126_s21 = sadd.s32 1, %s2682_s14 }
   0x6   : > { %p37_p0 = scmp.ge.s32.totalorder %s35_s20, 4  ;;  %p136_p1 = scmp.ne.s32.totalorder %s2682_s14, %s2678_s13 }
   0x7   : > { %p137_p2 = scmp.eq.s32.totalorder %s1989_s18, 3  ;;  %p142_p3 = scmp.ne.s32.totalorder %s2678_s13, %s2674_s12 }
   0x8   : > { %s3082_s20 = smov (%p37_p0, %s35_s20), 0  ;;  %p143_p5 = scmp.eq.s32.totalorder %s1990_s19, 3 }
   0x9   : > { %p2761_p4 = por %p137_p2, %p136_p1  ;;  %s121_s23 = ssub.s32 %s2690_s16, %s3082_s20 }
   0xa   : > { %p1995_p6 = scmp.ge.s32.totalorder %s2694_s17, 1  ;;  %p124_p7 = scmp.eq.s32.totalorder %s121_s23, 0 }
   0xb   : > { %p2768_p8 = por %p143_p5, %p142_p3  ;;  %p194_p9 = scmp.lt.s32.totalorder %s2694_s17, 5 }
   0xc   : > { %s2774_s25 = scalar_select %p124_p7, %s2682_s14, %s126_s21  }
   0xd   : > { %p195_p10 = pnand %p1995_p6, %p194_p9 }
   0xe   : > { %s1997_s5 = sshll.u32 (!%p195_p10), %s2686_s15, 6  ;;  %s231_s9 = sand.u32 (!%p195_p10), 1, %s2678_s13  }
   0xf   : > { %198 = sbr.rel (%p195_p10) target bundleno = 398 (0x18e), region = 32  ;;  %p236_p11 = scmp.lt.s32.totalorder (!%p195_p10), %s1997_s5, 255 }
  0x10   : > { %s1996_s10 = sshll.u32 (!%p195_p10), %s231_s9, 8  ;;  %s2241_s18 = sshll.u32 (!%p195_p10), %s2686_s15, 12 }
  0x11   : > { %s3017_s26 = scalar_lea.hbm (!%p195_p10), %s3073_s3, %s2241_s18  ;;  %s3025_s15 = scalar_lea.sflag (!%p195_p10), [#allocation4], %s231_s9 }
  0x12   : > { %s2698_s28 = smov (!%p195_p10), [#allocation3]  }
  0x13   : > { %s2622_s29 = sshll.u32 (!%p195_p10), %s2698_s28, 4  ;;  %s2623_s29 = int_to_ptr.vmem [resolvable:$false] %s2622_s29 }
  0x14   : > { %v2512_v0 = vld [vmem:[%s3071_s1 + $0x38] sm:$0xff]   ;;  %v2696_v1 = vmov 0   ;;  %v2513_v2 = vld [vmem:[%s3071_s1 + $0x30] sm:$0xff]   ;;  %v2514_v3 = vld [vmem:[%s3071_s1 + $0x28] sm:$0xff]   ;;  %s3084_s5 = smov (!%p236_p11, %s1997_s5), 255  ;;  %vm820_vm0 = vcmask 154624  }
  0x15   : > { %924 = vmatprep.subr.bf16.mxu0 %v2696_v1  ;;  %2433 = vmatprep.subr.bf16.mxu1 %v2696_v1  ;;  %v2515_v4 = vld [vmem:[%s3071_s1 + $0x20] sm:$0xff]   ;;  %s2176_s8 = sshll.u32 %s3084_s5, 3  ;;  %v2516_v5 = vld [vmem:[%s3071_s1 + $0x18] sm:$0xff]   ;;  %v2517_v8 = vld [vmem:[%s3071_s1 + $0x10] sm:$0xff]   ;;  %vm917_vm1 = vcmask 1040384   ;;  %vm918_vm2 = vcmask 1041408  }
  0x16   : > { %925 = vmatpush1.bf16.msra.mxu0 %v2512_v0  ;;  %2443 = vmatpush1.bf16.msra.mxu1 %v2512_v0  ;;  %s2792_s11 = scalar_lea.vmem %s3070_s0, %s2176_s8  ;;  %v2518_v9 = vld [vmem:[%s3071_s1 + $0x8] sm:$0xff]   ;;  %v2697_v10 = vmov 65535   ;;  %v2519_v12 = vld [vmem:[%s3071_s1] sm:$0xff]   ;;  %s2624_s30 = scalar_lea.vmem %s2623_s29, 8192 }
  0x17   : > { %926 = vmatprep.subr.bf16.mxu0 %v2696_v1  ;;  %2434 = vmatprep.subr.bf16.mxu1 %v2696_v1  ;;  %v2524_v6 = vld [vmem:[%s2792_s11 + $0x4] ss:$8 sps:$4 sm:$0xff]   ;;  %v919_v11 = vsel %vm917_vm1, 4294967295, %v2697_v10  ;;  %v2520_v13 = vld [vmem:[%s3071_s1 + $0x48] ss:$0 sps:$4 sm:$0x33]  }
  0x18   : > { %v2527_v7 = vld [vmem:[%s2792_s11 + $0x104] ss:$8 sps:$4 sm:$0xff]   ;;  %2074 = vmatprep.mubr.msk.bf16.mxu0 %vm820_vm0, %v2524_v6  ;;  %v920_v14 = vsel %vm918_vm2, %v919_v11, 0  ;;  %v2522_v17 = vld [vmem:[%s2792_s11] ss:$8 sps:$4 sm:$0xff]  }
  0x19   : > { %2090 = vmatprep.mubr.msk.bf16.mxu1 %vm820_vm0, %v2527_v7  ;;  %v922_v15 = vand.u32 %v2520_v13, %v920_v14  ;;  %v2521_v16 = vld [vmem:[%s3071_s1 + $0x40] sm:$0xff]   ;;  %v2528_v19 = vld [vmem:[%s2792_s11 + $0x14] ss:$8 sps:$4 sm:$0xff]   ;;  %v2532_v21 = vld [vmem:[%s2792_s11 + $0x10] ss:$8 sps:$4 sm:$0xff]  }
  0x1a   : > { %927 = vmatpush1.bf16.msra.mxu0 %v2513_v2  ;;  %2444 = vmatpush1.bf16.msra.mxu1 %v2513_v2  ;;  %v2525_v18 = vld [vmem:[%s2792_s11 + $0x100] ss:$8 sps:$4 sm:$0xff]   ;;  %v2530_v20 = vld [vmem:[%s2792_s11 + $0x114] ss:$8 sps:$4 sm:$0xff]   ;;  %v2533_v22 = vld [vmem:[%s2792_s11 + $0x110] ss:$8 sps:$4 sm:$0xff]  }
  0x1b   : > { %928 = vmatprep.subr.bf16.mxu0 %v2696_v1  ;;  %2435 = vmatprep.subr.bf16.mxu1 %v2696_v1  ;;  %v2534_v23 = vld [vmem:[%s2792_s11 + $0x24] ss:$8 sps:$4 sm:$0xff]   ;;  %v2538_v25 = vld [vmem:[%s2792_s11 + $0x20] ss:$8 sps:$4 sm:$0xff]   ;;  %v2540_v27 = vld [vmem:[%s2792_s11 + $0x34] ss:$8 sps:$4 sm:$0xff]  }
  0x1c   : > { %v2536_v24 = vld [vmem:[%s2792_s11 + $0x124] ss:$8 sps:$4 sm:$0xff]   ;;  %v2539_v26 = vld [vmem:[%s2792_s11 + $0x120] ss:$8 sps:$4 sm:$0xff]   ;;  %v2542_v28 = vld [vmem:[%s2792_s11 + $0x134] ss:$8 sps:$4 sm:$0xff]  }
  0x1d   : > { %v2544_v29 = vld [vmem:[%s2792_s11 + $0x30] ss:$8 sps:$4 sm:$0xff]   ;;  %v2546_v31 = vld [vmem:[%s2792_s11 + $0x44] ss:$8 sps:$4 sm:$0xff]   ;;  %v2550_v33 = vld [vmem:[%s2792_s11 + $0x40] ss:$8 sps:$4 sm:$0xff]  }
  0x1e   : > { %929 = vmatpush1.bf16.msra.mxu0 %v2514_v3  ;;  %2445 = vmatpush1.bf16.msra.mxu1 %v2514_v3  ;;  %v2545_v30 = vld [vmem:[%s2792_s11 + $0x130] ss:$8 sps:$4 sm:$0xff]   ;;  %v2548_v32 = vld [vmem:[%s2792_s11 + $0x144] ss:$8 sps:$4 sm:$0xff]   ;;  %v2551_v34 = vld [vmem:[%s2792_s11 + $0x140] ss:$8 sps:$4 sm:$0xff]  }
  0x1f   : > { %930 = vmatprep.subr.bf16.mxu0 %v2696_v1  ;;  %2436 = vmatprep.subr.bf16.mxu1 %v2696_v1  ;;  %v2552_v35 = vld [vmem:[%s2792_s11 + $0x54] ss:$8 sps:$4 sm:$0xff]   ;;  %v2556_v37 = vld [vmem:[%s2792_s11 + $0x50] ss:$8 sps:$4 sm:$0xff]   ;;  %v2558_v39 = vld [vmem:[%s2792_s11 + $0x64] ss:$8 sps:$4 sm:$0xff]  }
  0x20   : > { %v2554_v36 = vld [vmem:[%s2792_s11 + $0x154] ss:$8 sps:$4 sm:$0xff]   ;;  %v2557_v38 = vld [vmem:[%s2792_s11 + $0x150] ss:$8 sps:$4 sm:$0xff]   ;;  %v2560_v40 = vld [vmem:[%s2792_s11 + $0x164] ss:$8 sps:$4 sm:$0xff]  }
  0x21   : > { %v2562_v41 = vld [vmem:[%s2792_s11 + $0x60] ss:$8 sps:$4 sm:$0xff]   ;;  %v2564_v43 = vld [vmem:[%s2792_s11 + $0x74] ss:$8 sps:$4 sm:$0xff]   ;;  %v2568_v45 = vld [vmem:[%s2792_s11 + $0x70] ss:$8 sps:$4 sm:$0xff]  }
  0x22   : > { %931 = vmatpush1.bf16.msra.mxu0 %v2515_v4  ;;  %2446 = vmatpush1.bf16.msra.mxu1 %v2515_v4  ;;  %v2563_v42 = vld [vmem:[%s2792_s11 + $0x160] ss:$8 sps:$4 sm:$0xff]   ;;  %v2566_v44 = vld [vmem:[%s2792_s11 + $0x174] ss:$8 sps:$4 sm:$0xff]   ;;  %v2569_v46 = vld [vmem:[%s2792_s11 + $0x170] ss:$8 sps:$4 sm:$0xff]  }
  0x23   : > { %932 = vmatprep.subr.bf16.mxu0 %v2696_v1  ;;  %2437 = vmatprep.subr.bf16.mxu1 %v2696_v1  ;;  %v2570_v47 = vld [vmem:[%s2792_s11 + $0x84] ss:$8 sps:$4 sm:$0xff]   ;;  %v2574_v49 = vld [vmem:[%s2792_s11 + $0x80] ss:$8 sps:$4 sm:$0xff]   ;;  %v2576_v51 = vld [vmem:[%s2792_s11 + $0x94] ss:$8 sps:$4 sm:$0xff]  }
  0x24   : > { %v2572_v48 = vld [vmem:[%s2792_s11 + $0x184] ss:$8 sps:$4 sm:$0xff]   ;;  %v2575_v50 = vld [vmem:[%s2792_s11 + $0x180] ss:$8 sps:$4 sm:$0xff]   ;;  %v2578_v52 = vld [vmem:[%s2792_s11 + $0x194] ss:$8 sps:$4 sm:$0xff]  }
  0x25   : > { %v2580_v53 = vld [vmem:[%s2792_s11 + $0x90] ss:$8 sps:$4 sm:$0xff]   ;;  %v2582_v55 = vld [vmem:[%s2792_s11 + $0xa4] ss:$8 sps:$4 sm:$0xff]   ;;  %v2586_v57 = vld [vmem:[%s2792_s11 + $0xa0] ss:$8 sps:$4 sm:$0xff]  }
  0x26   : > { %933 = vmatpush1.bf16.msra.mxu0 %v2516_v5  ;;  %2447 = vmatpush1.bf16.msra.mxu1 %v2516_v5  ;;  %v2581_v54 = vld [vmem:[%s2792_s11 + $0x190] ss:$8 sps:$4 sm:$0xff]   ;;  %v2584_v56 = vld [vmem:[%s2792_s11 + $0x1a4] ss:$8 sps:$4 sm:$0xff]   ;;  %v2587_v58 = vld [vmem:[%s2792_s11 + $0x1a0] ss:$8 sps:$4 sm:$0xff]  }
  0x27   : > { %934 = vmatprep.subr.bf16.mxu0 %v2696_v1  ;;  %2438 = vmatprep.subr.bf16.mxu1 %v2696_v1  ;;  %v2588_v59 = vld [vmem:[%s2792_s11 + $0xb4] ss:$8 sps:$4 sm:$0xff]   ;;  %v2592_v61 = vld [vmem:[%s2792_s11 + $0xb0] ss:$8 sps:$4 sm:$0xff]   ;;  %v2594_v63 = vld [vmem:[%s2792_s11 + $0xc4] ss:$8 sps:$4 sm:$0xff]  }
  0x28   : > { %v2590_v60 = vld [vmem:[%s2792_s11 + $0x1b4] ss:$8 sps:$4 sm:$0xff]   ;;  %v2593_v62 = vld [vmem:[%s2792_s11 + $0x1b0] ss:$8 sps:$4 sm:$0xff]   ;;  %v2596_v0 = vld [vmem:[%s2792_s11 + $0x1c4] ss:$8 sps:$4 sm:$0xff]  }
  0x29   : > { %v2599_v2 = vld [vmem:[%s2792_s11 + $0x1c0] ss:$8 sps:$4 sm:$0xff]   ;;  %v2600_v3 = vld [vmem:[%s2792_s11 + $0xd4] ss:$8 sps:$4 sm:$0xff]   ;;  %v2604_v5 = vld [vmem:[%s2792_s11 + $0xd0] ss:$8 sps:$4 sm:$0xff]  }
  0x2a   : > { %935 = vmatpush1.bf16.msra.mxu0 %v2517_v8  ;;  %2448 = vmatpush1.bf16.msra.mxu1 %v2517_v8  ;;  %v2602_v4 = vld [vmem:[%s2792_s11 + $0x1d4] ss:$8 sps:$4 sm:$0xff]   ;;  %v2605_v6 = vld [vmem:[%s2792_s11 + $0x1d0] ss:$8 sps:$4 sm:$0xff]   ;;  %v2606_v7 = vld [vmem:[%s2792_s11 + $0xe4] ss:$8 sps:$4 sm:$0xff]  }
  0x2b   : > { %936 = vmatprep.subr.bf16.mxu0 %v2696_v1  ;;  %2439 = vmatprep.subr.bf16.mxu1 %v2696_v1  ;;  %v2608_v8 = vld [vmem:[%s2792_s11 + $0x1e4] ss:$8 sps:$4 sm:$0xff]   ;;  %v2611_v10 = vld [vmem:[%s2792_s11 + $0x1e0] ss:$8 sps:$4 sm:$0xff]   ;;  %v2612_v11 = vld [vmem:[%s2792_s11 + $0xf4] ss:$8 sps:$4 sm:$0xff]  }
  0x2c   : > { %v2616_v13 = vld [vmem:[%s2792_s11 + $0xf0] ss:$8 sps:$4 sm:$0xff]  }
  0x2d   : > { %v2617_v14 = vld [vmem:[%s2792_s11 + $0x1f0] ss:$8 sps:$4 sm:$0xff]  }
  0x2e   : > { %937 = vmatpush1.bf16.msra.mxu0 %v2518_v9  ;;  %2449 = vmatpush1.bf16.msra.mxu1 %v2518_v9  ;;  %v2610_v9 = vld [vmem:[%s2792_s11 + $0xe0] ss:$8 sps:$4 sm:$0xff]  }
  0x2f   : > { %938 = vmatprep.subr.bf16.mxu0 %v2696_v1  ;;  %2440 = vmatprep.subr.bf16.mxu1 %v2696_v1 }
  0x32   : > { %939 = vmatpush1.bf16.msra.mxu0 %v2519_v12  ;;  %2450 = vmatpush1.bf16.msra.mxu1 %v2519_v12  ;;  %v2614_v12 = vld [vmem:[%s2792_s11 + $0x1f4] ss:$8 sps:$4 sm:$0xff]  }
  0x33   : > { %952 = vmatprep.subr.bf16.mxu0 %v2696_v1  ;;  %2441 = vmatprep.subr.bf16.mxu1 %v2696_v1 }
  0x36   : > { %953 = vmatpush2.bf16.msra.mxu0 %v922_v15  ;;  %2451 = vmatpush2.bf16.msra.mxu1 %v922_v15 }
  0x37   : > { %954 = vmatprep.subr.bf16.mxu0 %v2696_v1  ;;  %2442 = vmatprep.subr.bf16.mxu1 %v2696_v1  ;;  %v2598_v1 = vld [vmem:[%s2792_s11 + $0xc0] ss:$8 sps:$4 sm:$0xff]   ;;  %s2920_s11 = scalar_lea.vmem [#allocation3], %s1996_s10 }
  0x38   : > { %s1878_s19 = sshll.u32 %s2920_s11, 4  ;;  %s3019_s19 = int_to_ptr.vmem [resolvable:$true] %s1878_s19 }
  0x39   : > { %s2618_s27 = scalar_lea.vmem %s3019_s19, 4096  ;;  %p2625_p1 = scmp.lt.s32.totalorder %s3019_s19, %s2623_s29 }
  0x3a   : > { %955 = vmatpush2.bf16.msra.mxu0 %v2521_v16  ;;  %2452 = vmatpush2.bf16.msra.mxu1 %v2521_v16  ;;  %v2911_v16 = vld [vmem:[%s3072_s2] ss:$0 sm:$0xff]  ;;  %p2619_p12 = scmp.ne.s32.totalorder %s3019_s19, %s2618_s27  ;;  %p2626_p2 = scmp.lt.s32.totalorder %s2624_s30, %s2618_s27 }
  0x3c   : > { %p2620_p13 = pnand %p2619_p12, %p2761_p4  ;;  %p2627_p3 = por %p2626_p2, %p2625_p1 }
  0x3d   : > { %957 = vmatmul.mubr.bf16.vlgmr.msra.gmra.mxu0 %v2522_v17  ;;  %1085 = vmatmul.mubr.bf16.vlgmr.msra.gmra.mxu1 %v2525_v18 }
  0x3e   : > { %2075 = vmatprep.mubr.msk.bf16.mxu0 %vm820_vm0, %v2528_v19  ;;  %2091 = vmatprep.mubr.msk.bf16.mxu1 %vm820_vm0, %v2530_v20  ;;  %p2621_p0 = pneg %p2620_p13 }
  0x40   : > { %p2628_p5 = pnand %p2627_p3, %p2621_p0 }
  0x45   : > { %965 = vmatmul.mubr.bf16.gmra.mxu0 %v2532_v21  ;;  %1093 = vmatmul.mubr.bf16.gmra.mxu1 %v2533_v22 }
  0x46   : > { %2076 = vmatprep.mubr.msk.bf16.mxu0 %vm820_vm0, %v2534_v23  ;;  %2092 = vmatprep.mubr.msk.bf16.mxu1 %vm820_vm0, %v2536_v24 }
  0x4d   : > { %973 = vmatmul.mubr.bf16.gmra.mxu0 %v2538_v25  ;;  %1101 = vmatmul.mubr.bf16.gmra.mxu1 %v2539_v26 }
  0x4e   : > { %2077 = vmatprep.mubr.msk.bf16.mxu0 %vm820_vm0, %v2540_v27  ;;  %2093 = vmatprep.mubr.msk.bf16.mxu1 %vm820_vm0, %v2542_v28 }
  0x55   : > { %981 = vmatmul.mubr.bf16.gmra.mxu0 %v2544_v29  ;;  %1109 = vmatmul.mubr.bf16.gmra.mxu1 %v2545_v30 }
  0x56   : > { %2078 = vmatprep.mubr.msk.bf16.mxu0 %vm820_vm0, %v2546_v31  ;;  %2094 = vmatprep.mubr.msk.bf16.mxu1 %vm820_vm0, %v2548_v32 }
  0x5d   : > { %989 = vmatmul.mubr.bf16.gmra.mxu0 %v2550_v33  ;;  %1117 = vmatmul.mubr.bf16.gmra.mxu1 %v2551_v34 }
  0x5e   : > { %2079 = vmatprep.mubr.msk.bf16.mxu0 %vm820_vm0, %v2552_v35  ;;  %2095 = vmatprep.mubr.msk.bf16.mxu1 %vm820_vm0, %v2554_v36 }
  0x65   : > { %997 = vmatmul.mubr.bf16.gmra.mxu0 %v2556_v37  ;;  %1125 = vmatmul.mubr.bf16.gmra.mxu1 %v2557_v38 }
  0x66   : > { %2080 = vmatprep.mubr.msk.bf16.mxu0 %vm820_vm0, %v2558_v39  ;;  %2096 = vmatprep.mubr.msk.bf16.mxu1 %vm820_vm0, %v2560_v40 }
  0x6d   : > { %1005 = vmatmul.mubr.bf16.gmra.mxu0 %v2562_v41  ;;  %1133 = vmatmul.mubr.bf16.gmra.mxu1 %v2563_v42 }
  0x6e   : > { %2081 = vmatprep.mubr.msk.bf16.mxu0 %vm820_vm0, %v2564_v43  ;;  %2097 = vmatprep.mubr.msk.bf16.mxu1 %vm820_vm0, %v2566_v44 }
  0x75   : > { %1013 = vmatmul.mubr.bf16.gmra.mxu0 %v2568_v45  ;;  %1141 = vmatmul.mubr.bf16.gmra.mxu1 %v2569_v46 }
  0x76   : > { %2082 = vmatprep.mubr.msk.bf16.mxu0 %vm820_vm0, %v2570_v47  ;;  %2098 = vmatprep.mubr.msk.bf16.mxu1 %vm820_vm0, %v2572_v48 }
  0x7d   : > { %1021 = vmatmul.mubr.bf16.gmra.mxu0 %v2574_v49  ;;  %1149 = vmatmul.mubr.bf16.gmra.mxu1 %v2575_v50 }
  0x7e   : > { %2083 = vmatprep.mubr.msk.bf16.mxu0 %vm820_vm0, %v2576_v51  ;;  %2099 = vmatprep.mubr.msk.bf16.mxu1 %vm820_vm0, %v2578_v52 }
  0x85   : > { %1029 = vmatmul.mubr.bf16.gmra.mxu0 %v2580_v53  ;;  %1157 = vmatmul.mubr.bf16.gmra.mxu1 %v2581_v54 }
  0x86   : > { %2084 = vmatprep.mubr.msk.bf16.mxu0 %vm820_vm0, %v2582_v55  ;;  %2100 = vmatprep.mubr.msk.bf16.mxu1 %vm820_vm0, %v2584_v56 }
  0x8d   : > { %1037 = vmatmul.mubr.bf16.gmra.mxu0 %v2586_v57  ;;  %1165 = vmatmul.mubr.bf16.gmra.mxu1 %v2587_v58 }
  0x8e   : > { %2085 = vmatprep.mubr.msk.bf16.mxu0 %vm820_vm0, %v2588_v59  ;;  %2101 = vmatprep.mubr.msk.bf16.mxu1 %vm820_vm0, %v2590_v60 }
  0x95   : > { %1045 = vmatmul.mubr.bf16.gmra.mxu0 %v2592_v61  ;;  %1173 = vmatmul.mubr.bf16.gmra.mxu1 %v2593_v62 }
  0x96   : > { %2086 = vmatprep.mubr.msk.bf16.mxu0 %vm820_vm0, %v2594_v63  ;;  %2102 = vmatprep.mubr.msk.bf16.mxu1 %vm820_vm0, %v2596_v0 }
  0x9d   : > { %1053 = vmatmul.mubr.bf16.gmra.mxu0 %v2598_v1  ;;  %1181 = vmatmul.mubr.bf16.gmra.mxu1 %v2599_v2 }
  0x9e   : > { %2087 = vmatprep.mubr.msk.bf16.mxu0 %vm820_vm0, %v2600_v3  ;;  %2103 = vmatprep.mubr.msk.bf16.mxu1 %vm820_vm0, %v2602_v4 }
  0xa5   : > { %1061 = vmatmul.mubr.bf16.gmra.mxu0 %v2604_v5  ;;  %1189 = vmatmul.mubr.bf16.gmra.mxu1 %v2605_v6 }
  0xa6   : > { %2088 = vmatprep.mubr.msk.bf16.mxu0 %vm820_vm0, %v2606_v7  ;;  %2104 = vmatprep.mubr.msk.bf16.mxu1 %vm820_vm0, %v2608_v8 }
  0xad   : > { %1069 = vmatmul.mubr.bf16.gmra.mxu0 %v2610_v9  ;;  %1197 = vmatmul.mubr.bf16.gmra.mxu1 %v2611_v10 }
  0xae   : > { %2089 = vmatprep.mubr.msk.bf16.mxu0 %vm820_vm0, %v2612_v11  ;;  %2105 = vmatprep.mubr.msk.bf16.mxu1 %vm820_vm0, %v2614_v12 }
  0xb5   : > { %1077 = vmatmul.mubr.bf16.gmra.mxu0 %v2616_v13  ;;  %1205 = vmatmul.mubr.bf16.gmra.mxu1 %v2617_v14 }
  0xfd   : > { %v958_v15 = vpop.f32.mrf.mxu0  ;;  %v1086_v17 = vpop.f32.mrf.mxu1 }
  0xfe   : > { %v1415_v20 = vadd.f32 %v2911_v16, %v958_v15  ;;  %v1447_v21 = vadd.f32 %v2911_v16, %v1086_v17 }
  0xff   : > { %v960_v18 = vpop.f32.mrf.mxu0  ;;  %v1088_v19 = vpop.f32.mrf.mxu1 }
 0x100   : > { %v1479_v28 = vmax.f32 %v1415_v20, 0.0  ;;  %v1511_v29 = vmax.f32 %v1447_v21, 0.0 }
 0x101   : > { %v961_v22 = vpop.f32.mrf.mxu0  ;;  %v1089_v23 = vpop.f32.mrf.mxu1 }
 0x102   : > { %v1416_v24 = vadd.f32 %v2911_v16, %v961_v22  ;;  %v1448_v25 = vadd.f32 %v2911_v16, %v1089_v23 }
 0x103   : > { %v963_v26 = vpop.f32.mrf.mxu0  ;;  %v1091_v27 = vpop.f32.mrf.mxu1 }
 0x104   : > { %v1480_v30 = vmax.f32 %v1416_v24, 0.0  ;;  %v1512_v31 = vmax.f32 %v1448_v25, 0.0 }
 0x105   : > { %v966_v32 = vpop.f32.mrf.mxu0  ;;  %v1094_v33 = vpop.f32.mrf.mxu1 }
 0x106   : > { %v2245_v34 = vpack.c.bf16 %v1480_v30, %v1479_v28  ;;  %v2325_v35 = vpack.c.bf16 %v1512_v31, %v1511_v29  ;;  %v1417_v38 = vadd.f32 %v2911_v16, %v966_v32  ;;  %v1449_v39 = vadd.f32 %v2911_v16, %v1094_v33 }
 0x107   : > { %v968_v36 = vpop.f32.mrf.mxu0  ;;  %v1096_v37 = vpop.f32.mrf.mxu1 }
 0x108   : > { %2246 = vst [vmem:[%s2920_s11] sm:$0xff] %v2245_v34   ;;  %2417 = vst [vmem:[%s2920_s11 + $0x80] sm:$0xff] %v2325_v35   ;;  %v1481_v46 = vmax.f32 %v1417_v38, 0.0  ;;  %v1513_v47 = vmax.f32 %v1449_v39, 0.0 }
 0x109   : > { %v969_v40 = vpop.f32.mrf.mxu0  ;;  %v1097_v41 = vpop.f32.mrf.mxu1 }
 0x10a   : > { %v1418_v42 = vadd.f32 %v2911_v16, %v969_v40  ;;  %v1450_v43 = vadd.f32 %v2911_v16, %v1097_v41 }
 0x10b   : > { %v971_v44 = vpop.f32.mrf.mxu0  ;;  %v1099_v45 = vpop.f32.mrf.mxu1 }
 0x10c   : > { %v1482_v48 = vmax.f32 %v1418_v42, 0.0  ;;  %v1514_v49 = vmax.f32 %v1450_v43, 0.0 }
 0x10d   : > { %v974_v50 = vpop.f32.mrf.mxu0  ;;  %v1102_v51 = vpop.f32.mrf.mxu1 }
 0x10e   : > { %v2250_v52 = vpack.c.bf16 %v1482_v48, %v1481_v46  ;;  %v2330_v53 = vpack.c.bf16 %v1514_v49, %v1513_v47  ;;  %v1419_v56 = vadd.f32 %v2911_v16, %v974_v50  ;;  %v1451_v57 = vadd.f32 %v2911_v16, %v1102_v51 }
 0x10f   : > { %v976_v54 = vpop.f32.mrf.mxu0  ;;  %v1104_v55 = vpop.f32.mrf.mxu1 }
 0x110   : > { %2402 = vst [vmem:[%s2920_s11 + $0x8] sm:$0xff] %v2250_v52   ;;  %2418 = vst [vmem:[%s2920_s11 + $0x88] sm:$0xff] %v2330_v53   ;;  %v1483_v0 = vmax.f32 %v1419_v56, 0.0  ;;  %v1515_v1 = vmax.f32 %v1451_v57, 0.0 }
 0x111   : > { %v977_v58 = vpop.f32.mrf.mxu0  ;;  %v1105_v59 = vpop.f32.mrf.mxu1 }
 0x112   : > { %v1420_v60 = vadd.f32 %v2911_v16, %v977_v58  ;;  %v1452_v61 = vadd.f32 %v2911_v16, %v1105_v59 }
 0x113   : > { %v979_v62 = vpop.f32.mrf.mxu0  ;;  %v1107_v63 = vpop.f32.mrf.mxu1 }
 0x114   : > { %v1484_v2 = vmax.f32 %v1420_v60, 0.0  ;;  %v1516_v3 = vmax.f32 %v1452_v61, 0.0 }
 0x115   : > { %v982_v4 = vpop.f32.mrf.mxu0  ;;  %v1110_v5 = vpop.f32.mrf.mxu1 }
 0x116   : > { %v2255_v6 = vpack.c.bf16 %v1484_v2, %v1483_v0  ;;  %v2335_v7 = vpack.c.bf16 %v1516_v3, %v1515_v1  ;;  %v1421_v10 = vadd.f32 %v2911_v16, %v982_v4  ;;  %v1453_v11 = vadd.f32 %v2911_v16, %v1110_v5 }
 0x117   : > { %v984_v8 = vpop.f32.mrf.mxu0  ;;  %v1112_v9 = vpop.f32.mrf.mxu1 }
 0x118   : > { %2403 = vst [vmem:[%s2920_s11 + $0x10] sm:$0xff] %v2255_v6   ;;  %2419 = vst [vmem:[%s2920_s11 + $0x90] sm:$0xff] %v2335_v7   ;;  %v1485_v19 = vmax.f32 %v1421_v10, 0.0  ;;  %v1517_v20 = vmax.f32 %v1453_v11, 0.0 }
 0x119   : > { %v985_v12 = vpop.f32.mrf.mxu0  ;;  %v1113_v13 = vpop.f32.mrf.mxu1 }
 0x11a   : > { %v1422_v14 = vadd.f32 %v2911_v16, %v985_v12  ;;  %v1454_v15 = vadd.f32 %v2911_v16, %v1113_v13 }
 0x11b   : > { %v987_v17 = vpop.f32.mrf.mxu0  ;;  %v1115_v18 = vpop.f32.mrf.mxu1 }
 0x11c   : > { %v1486_v21 = vmax.f32 %v1422_v14, 0.0  ;;  %v1518_v22 = vmax.f32 %v1454_v15, 0.0 }
 0x11d   : > { %v990_v23 = vpop.f32.mrf.mxu0  ;;  %v1118_v24 = vpop.f32.mrf.mxu1 }
 0x11e   : > { %v2260_v25 = vpack.c.bf16 %v1486_v21, %v1485_v19  ;;  %v2340_v26 = vpack.c.bf16 %v1518_v22, %v1517_v20  ;;  %v1423_v29 = vadd.f32 %v2911_v16, %v990_v23  ;;  %v1455_v30 = vadd.f32 %v2911_v16, %v1118_v24 }
 0x11f   : > { %v992_v27 = vpop.f32.mrf.mxu0  ;;  %v1120_v28 = vpop.f32.mrf.mxu1 }
 0x120   : > { %2404 = vst [vmem:[%s2920_s11 + $0x18] sm:$0xff] %v2260_v25   ;;  %2420 = vst [vmem:[%s2920_s11 + $0x98] sm:$0xff] %v2340_v26   ;;  %v1487_v37 = vmax.f32 %v1423_v29, 0.0  ;;  %v1519_v38 = vmax.f32 %v1455_v30, 0.0 }
 0x121   : > { %v993_v31 = vpop.f32.mrf.mxu0  ;;  %v1121_v32 = vpop.f32.mrf.mxu1 }
 0x122   : > { %v1424_v33 = vadd.f32 %v2911_v16, %v993_v31  ;;  %v1456_v34 = vadd.f32 %v2911_v16, %v1121_v32 }
 0x123   : > { %v995_v35 = vpop.f32.mrf.mxu0  ;;  %v1123_v36 = vpop.f32.mrf.mxu1 }
 0x124   : > { %v1488_v39 = vmax.f32 %v1424_v33, 0.0  ;;  %v1520_v40 = vmax.f32 %v1456_v34, 0.0 }
 0x125   : > { %v998_v41 = vpop.f32.mrf.mxu0  ;;  %v1126_v42 = vpop.f32.mrf.mxu1 }
 0x126   : > { %v2265_v43 = vpack.c.bf16 %v1488_v39, %v1487_v37  ;;  %v2345_v44 = vpack.c.bf16 %v1520_v40, %v1519_v38  ;;  %v1425_v47 = vadd.f32 %v2911_v16, %v998_v41  ;;  %v1457_v48 = vadd.f32 %v2911_v16, %v1126_v42 }
 0x127   : > { %v1000_v45 = vpop.f32.mrf.mxu0  ;;  %v1128_v46 = vpop.f32.mrf.mxu1 }
 0x128   : > { %2405 = vst [vmem:[%s2920_s11 + $0x20] sm:$0xff] %v2265_v43   ;;  %2421 = vst [vmem:[%s2920_s11 + $0xa0] sm:$0xff] %v2345_v44   ;;  %v1489_v55 = vmax.f32 %v1425_v47, 0.0  ;;  %v1521_v56 = vmax.f32 %v1457_v48, 0.0 }
 0x129   : > { %v1001_v49 = vpop.f32.mrf.mxu0  ;;  %v1129_v50 = vpop.f32.mrf.mxu1 }
 0x12a   : > { %v1426_v51 = vadd.f32 %v2911_v16, %v1001_v49  ;;  %v1458_v52 = vadd.f32 %v2911_v16, %v1129_v50 }
 0x12b   : > { %v1003_v53 = vpop.f32.mrf.mxu0  ;;  %v1131_v54 = vpop.f32.mrf.mxu1 }
 0x12c   : > { %v1490_v57 = vmax.f32 %v1426_v51, 0.0  ;;  %v1522_v58 = vmax.f32 %v1458_v52, 0.0 }
 0x12d   : > { %v1006_v59 = vpop.f32.mrf.mxu0  ;;  %v1134_v60 = vpop.f32.mrf.mxu1 }
 0x12e   : > { %v2270_v61 = vpack.c.bf16 %v1490_v57, %v1489_v55  ;;  %v2350_v62 = vpack.c.bf16 %v1522_v58, %v1521_v56  ;;  %v1427_v1 = vadd.f32 %v2911_v16, %v1006_v59  ;;  %v1459_v2 = vadd.f32 %v2911_v16, %v1134_v60 }
 0x12f   : > { %v1008_v63 = vpop.f32.mrf.mxu0  ;;  %v1136_v0 = vpop.f32.mrf.mxu1 }
 0x130   : > { %2406 = vst [vmem:[%s2920_s11 + $0x28] sm:$0xff] %v2270_v61   ;;  %2422 = vst [vmem:[%s2920_s11 + $0xa8] sm:$0xff] %v2350_v62   ;;  %v1491_v9 = vmax.f32 %v1427_v1, 0.0  ;;  %v1523_v10 = vmax.f32 %v1459_v2, 0.0 }
 0x131   : > { %v1009_v3 = vpop.f32.mrf.mxu0  ;;  %v1137_v4 = vpop.f32.mrf.mxu1 }
 0x132   : > { %v1428_v5 = vadd.f32 %v2911_v16, %v1009_v3  ;;  %v1460_v6 = vadd.f32 %v2911_v16, %v1137_v4 }
 0x133   : > { %v1011_v7 = vpop.f32.mrf.mxu0  ;;  %v1139_v8 = vpop.f32.mrf.mxu1 }
 0x134   : > { %v1492_v11 = vmax.f32 %v1428_v5, 0.0  ;;  %v1524_v12 = vmax.f32 %v1460_v6, 0.0 }
 0x135   : > { %v1014_v13 = vpop.f32.mrf.mxu0  ;;  %v1142_v14 = vpop.f32.mrf.mxu1 }
 0x136   : > { %v2275_v15 = vpack.c.bf16 %v1492_v11, %v1491_v9  ;;  %v2355_v17 = vpack.c.bf16 %v1524_v12, %v1523_v10  ;;  %v1429_v20 = vadd.f32 %v2911_v16, %v1014_v13  ;;  %v1461_v21 = vadd.f32 %v2911_v16, %v1142_v14 }
 0x137   : > { %v1016_v18 = vpop.f32.mrf.mxu0  ;;  %v1144_v19 = vpop.f32.mrf.mxu1 }
 0x138   : > { %2407 = vst [vmem:[%s2920_s11 + $0x30] sm:$0xff] %v2275_v15   ;;  %2423 = vst [vmem:[%s2920_s11 + $0xb0] sm:$0xff] %v2355_v17   ;;  %v1493_v28 = vmax.f32 %v1429_v20, 0.0  ;;  %v1525_v29 = vmax.f32 %v1461_v21, 0.0 }
 0x139   : > { %v1017_v22 = vpop.f32.mrf.mxu0  ;;  %v1145_v23 = vpop.f32.mrf.mxu1 }
 0x13a   : > { %v1430_v24 = vadd.f32 %v2911_v16, %v1017_v22  ;;  %v1462_v25 = vadd.f32 %v2911_v16, %v1145_v23 }
 0x13b   : > { %v1019_v26 = vpop.f32.mrf.mxu0  ;;  %v1147_v27 = vpop.f32.mrf.mxu1 }
 0x13c   : > { %v1494_v30 = vmax.f32 %v1430_v24, 0.0  ;;  %v1526_v31 = vmax.f32 %v1462_v25, 0.0 }
 0x13d   : > { %v1022_v32 = vpop.f32.mrf.mxu0  ;;  %v1150_v33 = vpop.f32.mrf.mxu1 }
 0x13e   : > { %v2280_v34 = vpack.c.bf16 %v1494_v30, %v1493_v28  ;;  %v2360_v35 = vpack.c.bf16 %v1526_v31, %v1525_v29  ;;  %v1431_v38 = vadd.f32 %v2911_v16, %v1022_v32  ;;  %v1463_v39 = vadd.f32 %v2911_v16, %v1150_v33 }
 0x13f   : > { %v1024_v36 = vpop.f32.mrf.mxu0  ;;  %v1152_v37 = vpop.f32.mrf.mxu1 }
 0x140   : > { %2408 = vst [vmem:[%s2920_s11 + $0x38] sm:$0xff] %v2280_v34   ;;  %2424 = vst [vmem:[%s2920_s11 + $0xb8] sm:$0xff] %v2360_v35   ;;  %v1495_v46 = vmax.f32 %v1431_v38, 0.0  ;;  %v1527_v47 = vmax.f32 %v1463_v39, 0.0 }
 0x141   : > { %v1025_v40 = vpop.f32.mrf.mxu0  ;;  %v1153_v41 = vpop.f32.mrf.mxu1 }
 0x142   : > { %v1432_v42 = vadd.f32 %v2911_v16, %v1025_v40  ;;  %v1464_v43 = vadd.f32 %v2911_v16, %v1153_v41 }
 0x143   : > { %v1027_v44 = vpop.f32.mrf.mxu0  ;;  %v1155_v45 = vpop.f32.mrf.mxu1 }
 0x144   : > { %v1496_v48 = vmax.f32 %v1432_v42, 0.0  ;;  %v1528_v49 = vmax.f32 %v1464_v43, 0.0 }
 0x145   : > { %v1030_v50 = vpop.f32.mrf.mxu0  ;;  %v1158_v51 = vpop.f32.mrf.mxu1 }
 0x146   : > { %v2285_v52 = vpack.c.bf16 %v1496_v48, %v1495_v46  ;;  %v2365_v53 = vpack.c.bf16 %v1528_v49, %v1527_v47  ;;  %v1433_v56 = vadd.f32 %v2911_v16, %v1030_v50  ;;  %v1465_v57 = vadd.f32 %v2911_v16, %v1158_v51 }
 0x147   : > { %v1032_v54 = vpop.f32.mrf.mxu0  ;;  %v1160_v55 = vpop.f32.mrf.mxu1 }
 0x148   : > { %2409 = vst [vmem:[%s2920_s11 + $0x40] sm:$0xff] %v2285_v52   ;;  %2425 = vst [vmem:[%s2920_s11 + $0xc0] sm:$0xff] %v2365_v53   ;;  %v1497_v0 = vmax.f32 %v1433_v56, 0.0  ;;  %v1529_v1 = vmax.f32 %v1465_v57, 0.0 }
 0x149   : > { %v1033_v58 = vpop.f32.mrf.mxu0  ;;  %v1161_v59 = vpop.f32.mrf.mxu1 }
 0x14a   : > { %v1434_v60 = vadd.f32 %v2911_v16, %v1033_v58  ;;  %v1466_v61 = vadd.f32 %v2911_v16, %v1161_v59 }
 0x14b   : > { %v1035_v62 = vpop.f32.mrf.mxu0  ;;  %v1163_v63 = vpop.f32.mrf.mxu1 }
 0x14c   : > { %v1498_v2 = vmax.f32 %v1434_v60, 0.0  ;;  %v1530_v3 = vmax.f32 %v1466_v61, 0.0 }
 0x14d   : > { %v1038_v4 = vpop.f32.mrf.mxu0  ;;  %v1166_v5 = vpop.f32.mrf.mxu1 }
 0x14e   : > { %v2290_v6 = vpack.c.bf16 %v1498_v2, %v1497_v0  ;;  %v2370_v7 = vpack.c.bf16 %v1530_v3, %v1529_v1  ;;  %v1435_v10 = vadd.f32 %v2911_v16, %v1038_v4  ;;  %v1467_v11 = vadd.f32 %v2911_v16, %v1166_v5 }
 0x14f   : > { %v1040_v8 = vpop.f32.mrf.mxu0  ;;  %v1168_v9 = vpop.f32.mrf.mxu1 }
 0x150   : > { %2410 = vst [vmem:[%s2920_s11 + $0x48] sm:$0xff] %v2290_v6   ;;  %2426 = vst [vmem:[%s2920_s11 + $0xc8] sm:$0xff] %v2370_v7   ;;  %v1499_v19 = vmax.f32 %v1435_v10, 0.0  ;;  %v1531_v20 = vmax.f32 %v1467_v11, 0.0 }
 0x151   : > { %v1041_v12 = vpop.f32.mrf.mxu0  ;;  %v1169_v13 = vpop.f32.mrf.mxu1 }
 0x152   : > { %v1436_v14 = vadd.f32 %v2911_v16, %v1041_v12  ;;  %v1468_v15 = vadd.f32 %v2911_v16, %v1169_v13 }
 0x153   : > { %v1043_v17 = vpop.f32.mrf.mxu0  ;;  %v1171_v18 = vpop.f32.mrf.mxu1 }
 0x154   : > { %v1500_v21 = vmax.f32 %v1436_v14, 0.0  ;;  %v1532_v22 = vmax.f32 %v1468_v15, 0.0 }
 0x155   : > { %v1046_v23 = vpop.f32.mrf.mxu0  ;;  %v1174_v24 = vpop.f32.mrf.mxu1 }
 0x156   : > { %v2295_v25 = vpack.c.bf16 %v1500_v21, %v1499_v19  ;;  %v2375_v26 = vpack.c.bf16 %v1532_v22, %v1531_v20  ;;  %v1437_v29 = vadd.f32 %v2911_v16, %v1046_v23  ;;  %v1469_v30 = vadd.f32 %v2911_v16, %v1174_v24 }
 0x157   : > { %v1048_v27 = vpop.f32.mrf.mxu0  ;;  %v1176_v28 = vpop.f32.mrf.mxu1 }
 0x158   : > { %2411 = vst [vmem:[%s2920_s11 + $0x50] sm:$0xff] %v2295_v25   ;;  %2427 = vst [vmem:[%s2920_s11 + $0xd0] sm:$0xff] %v2375_v26   ;;  %v1501_v37 = vmax.f32 %v1437_v29, 0.0  ;;  %v1533_v38 = vmax.f32 %v1469_v30, 0.0 }
 0x159   : > { %v1049_v31 = vpop.f32.mrf.mxu0  ;;  %v1177_v32 = vpop.f32.mrf.mxu1 }
 0x15a   : > { %v1438_v33 = vadd.f32 %v2911_v16, %v1049_v31  ;;  %v1470_v34 = vadd.f32 %v2911_v16, %v1177_v32 }
 0x15b   : > { %v1051_v35 = vpop.f32.mrf.mxu0  ;;  %v1179_v36 = vpop.f32.mrf.mxu1 }
 0x15c   : > { %v1502_v39 = vmax.f32 %v1438_v33, 0.0  ;;  %v1534_v40 = vmax.f32 %v1470_v34, 0.0 }
 0x15d   : > { %v1054_v41 = vpop.f32.mrf.mxu0  ;;  %v1182_v42 = vpop.f32.mrf.mxu1 }
 0x15e   : > { %v2300_v43 = vpack.c.bf16 %v1502_v39, %v1501_v37  ;;  %v2380_v44 = vpack.c.bf16 %v1534_v40, %v1533_v38  ;;  %v1439_v47 = vadd.f32 %v2911_v16, %v1054_v41  ;;  %v1471_v48 = vadd.f32 %v2911_v16, %v1182_v42 }
 0x15f   : > { %v1056_v45 = vpop.f32.mrf.mxu0  ;;  %v1184_v46 = vpop.f32.mrf.mxu1 }
 0x160   : > { %2412 = vst [vmem:[%s2920_s11 + $0x58] sm:$0xff] %v2300_v43   ;;  %2428 = vst [vmem:[%s2920_s11 + $0xd8] sm:$0xff] %v2380_v44   ;;  %v1503_v55 = vmax.f32 %v1439_v47, 0.0  ;;  %v1535_v56 = vmax.f32 %v1471_v48, 0.0 }
 0x161   : > { %v1057_v49 = vpop.f32.mrf.mxu0  ;;  %v1185_v50 = vpop.f32.mrf.mxu1 }
 0x162   : > { %v1440_v51 = vadd.f32 %v2911_v16, %v1057_v49  ;;  %v1472_v52 = vadd.f32 %v2911_v16, %v1185_v50 }
 0x163   : > { %v1059_v53 = vpop.f32.mrf.mxu0  ;;  %v1187_v54 = vpop.f32.mrf.mxu1 }
 0x164   : > { %v1504_v57 = vmax.f32 %v1440_v51, 0.0  ;;  %v1536_v58 = vmax.f32 %v1472_v52, 0.0 }
 0x165   : > { %v1062_v59 = vpop.f32.mrf.mxu0  ;;  %v1190_v60 = vpop.f32.mrf.mxu1 }
 0x166   : > { %v2305_v61 = vpack.c.bf16 %v1504_v57, %v1503_v55  ;;  %v2385_v62 = vpack.c.bf16 %v1536_v58, %v1535_v56  ;;  %v1441_v1 = vadd.f32 %v2911_v16, %v1062_v59  ;;  %v1473_v2 = vadd.f32 %v2911_v16, %v1190_v60 }
 0x167   : > { %v1064_v63 = vpop.f32.mrf.mxu0  ;;  %v1192_v0 = vpop.f32.mrf.mxu1 }
 0x168   : > { %2413 = vst [vmem:[%s2920_s11 + $0x60] sm:$0xff] %v2305_v61   ;;  %2429 = vst [vmem:[%s2920_s11 + $0xe0] sm:$0xff] %v2385_v62   ;;  %v1505_v9 = vmax.f32 %v1441_v1, 0.0  ;;  %v1537_v10 = vmax.f32 %v1473_v2, 0.0 }
 0x169   : > { %v1065_v3 = vpop.f32.mrf.mxu0  ;;  %v1193_v4 = vpop.f32.mrf.mxu1 }
 0x16a   : > { %v1442_v5 = vadd.f32 %v2911_v16, %v1065_v3  ;;  %v1474_v6 = vadd.f32 %v2911_v16, %v1193_v4 }
 0x16b   : > { %v1067_v7 = vpop.f32.mrf.mxu0  ;;  %v1195_v8 = vpop.f32.mrf.mxu1 }
 0x16c   : > { %v1506_v11 = vmax.f32 %v1442_v5, 0.0  ;;  %v1538_v12 = vmax.f32 %v1474_v6, 0.0 }
 0x16d   : > { %v1070_v13 = vpop.f32.mrf.mxu0  ;;  %v1198_v14 = vpop.f32.mrf.mxu1 }
 0x16e   : > { %v2310_v15 = vpack.c.bf16 %v1506_v11, %v1505_v9  ;;  %v2390_v17 = vpack.c.bf16 %v1538_v12, %v1537_v10  ;;  %v1443_v20 = vadd.f32 %v2911_v16, %v1070_v13  ;;  %v1475_v21 = vadd.f32 %v2911_v16, %v1198_v14 }
 0x16f   : > { %v1072_v18 = vpop.f32.mrf.mxu0  ;;  %v1200_v19 = vpop.f32.mrf.mxu1 }
 0x170   : > { %2414 = vst [vmem:[%s2920_s11 + $0x68] sm:$0xff] %v2310_v15   ;;  %2430 = vst [vmem:[%s2920_s11 + $0xe8] sm:$0xff] %v2390_v17   ;;  %v1507_v28 = vmax.f32 %v1443_v20, 0.0  ;;  %v1539_v29 = vmax.f32 %v1475_v21, 0.0 }
 0x171   : > { %v1073_v22 = vpop.f32.mrf.mxu0  ;;  %v1201_v23 = vpop.f32.mrf.mxu1 }
 0x172   : > { %v1444_v24 = vadd.f32 %v2911_v16, %v1073_v22  ;;  %v1476_v25 = vadd.f32 %v2911_v16, %v1201_v23 }
 0x173   : > { %v1075_v26 = vpop.f32.mrf.mxu0  ;;  %v1203_v27 = vpop.f32.mrf.mxu1 }
 0x174   : > { %v1508_v30 = vmax.f32 %v1444_v24, 0.0  ;;  %v1540_v31 = vmax.f32 %v1476_v25, 0.0 }
 0x175   : > { %v1078_v32 = vpop.f32.mrf.mxu0  ;;  %v1206_v33 = vpop.f32.mrf.mxu1 }
 0x176   : > { %v2315_v34 = vpack.c.bf16 %v1508_v30, %v1507_v28  ;;  %v2395_v35 = vpack.c.bf16 %v1540_v31, %v1539_v29  ;;  %v1445_v38 = vadd.f32 %v2911_v16, %v1078_v32  ;;  %v1477_v39 = vadd.f32 %v2911_v16, %v1206_v33 }
 0x177   : > { %v1080_v36 = vpop.f32.mrf.mxu0  ;;  %v1208_v37 = vpop.f32.mrf.mxu1 }
 0x178   : > { %2415 = vst [vmem:[%s2920_s11 + $0x70] sm:$0xff] %v2315_v34   ;;  %2431 = vst [vmem:[%s2920_s11 + $0xf0] sm:$0xff] %v2395_v35   ;;  %v1509_v46 = vmax.f32 %v1445_v38, 0.0  ;;  %v1541_v47 = vmax.f32 %v1477_v39, 0.0 }
 0x179   : > { %v1081_v40 = vpop.f32.mrf.mxu0  ;;  %v1209_v41 = vpop.f32.mrf.mxu1 }
 0x17a   : > { %v1446_v42 = vadd.f32 %v2911_v16, %v1081_v40  ;;  %v1478_v43 = vadd.f32 %v2911_v16, %v1209_v41 }
 0x17b   : > { %v1083_v44 = vpop.f32.mrf.mxu0  ;;  %v1211_v45 = vpop.f32.mrf.mxu1 }
 0x17c   : > { %v1510_v48 = vmax.f32 %v1446_v42, 0.0  ;;  %v1542_v49 = vmax.f32 %v1478_v43, 0.0 }
 0x17e   : > { %v2320_v16 = vpack.c.bf16 %v1510_v48, %v1509_v46  ;;  %v2400_v50 = vpack.c.bf16 %v1542_v49, %v1541_v47 }
 0x180   : > { %2416 = vst [vmem:[%s2920_s11 + $0x78] sm:$0xff] %v2320_v16   ;;  %2432 = vst [vmem:[%s2920_s11 + $0xf8] sm:$0xff] %v2400_v50  }
 0x181   : > { %2631 = shalt.err (!%p2628_p5)
}
 0x182   : > { %s2632_s4 = scalar_lea.hbm %s3017_s26, 4096  ;;  %s2636_s7 = scalar_lea.hbm %s3073_s3, 16384 }
 0x183   : > { %p2633_p6 = scmp.ne.s32.totalorder %s3017_s26, %s2632_s4  ;;  %p2637_p10 = scmp.lt.s32.totalorder %s3017_s26, %s3073_s3 }
 0x184   : > { %p2638_p11 = scmp.lt.s32.totalorder %s2636_s7, %s2632_s4 }
 0x185   : > { %p2634_p7 = pnand %p2633_p6, %p2761_p4 }
 0x186   : > { %p2639_p12 = por %p2638_p11, %p2637_p10 }
 0x187   : > { %p2635_p9 = pneg %p2634_p7 }
 0x189   : > { %p2640_p13 = pnand %p2639_p12, %p2635_p9 }
 0x18b   : > { %2643 = shalt.err (!%p2640_p13)
}
 0x18c   : > { %s2699_s10 = smov 64   ;;  %s2700_s11 = smov 4  }
 0x18d   : > { %2453 = dma.vmem_to_hbm [thread:$0]  (%p2761_p4), %s3019_s19, 4096, %s3017_s26, %s3025_s15, %s2699_s10, %s2699_s10, %s2700_s11  }
 0x18e PF: > { %p2459_p0 = scmp.ge.s32.totalorder %s2694_s17, 2  ;;  %s1893_s18 = sand.u32 1, %s2674_s12  }
 0x18f   : > { %s1894_s21 = scalar_lea.sflag [#allocation4], %s1893_s18 }
 0x190   : > { %p2456_p1 = pnand %p2459_p0, %p2768_p8 }
 0x192   : > { %p2457_p2 = pneg %p2456_p1 }
 0x194   : > { %2669 = dma.done.wait (%p2457_p2), %s1894_s21, 4096  }
 0x195   : > { %2671 = vsyncadd (%p2457_p2), %s1894_s21, 4294963200  ;;  %s16_s17 = sadd.s32 1, %s2694_s17   ;;  %s3076_s12 = smov %s2678_s13 }
 0x196   : > { %p13_p3 = scmp.ge.s32.totalorder %s16_s17, 6   ;;  %s3077_s13 = smov %s2682_s14 }
 0x197   : > { %s3078_s14 = smov %s2774_s25  ;;  %s3079_s15 = smov %s2690_s16 }
 0x198   : > { %s3080_s16 = smov %s3082_s20  ;;  %15 = sbr.rel (!%p13_p3) target bundleno = 4 (0x4), region = 81 }
 0x19d   :  { %1899 = vsyncpa [#allocation4], 1 }
 0x19e   :  { %1901 = vsyncpa [#allocation4 + $0x1], 1 }

</bundles_post_ra>
